<compile_context>
chip_gen: v5e
topology: v5e:2x2
jax: 0.10.0
libtpu: 0.0.40
codegen_flags: <defaults>
</compile_context>

<pallas_src>
import jax
import jax.numpy as jnp
from jax.experimental import pallas as pl
from jax.experimental.pallas import tpu as pltpu


def _round_up(x, m):
    return ((x + m - 1) // m) * m


def _make_critic_kernel(activation, block_rows, matmul_dtype):
    """block_rows = tm // 128; output block is (1, block_rows, 128)."""

    def kernel(x_ref, w1_ref, b1_ref, w2_ref, b2_ref, w3_ref, b3_ref, o_ref):
        # Hidden layers on the MXU with f32 accumulation (biases / activations
        # stay f32: v5e has no bf16 VPU/EUP path).
        x = x_ref[...].astype(matmul_dtype)
        h1 = activation(
            jnp.dot(x, w1_ref[...], preferred_element_type=jnp.float32)
            + b1_ref[...]
        )
        h2 = activation(
            jnp.dot(h1.astype(matmul_dtype), w2_ref[...],
                    preferred_element_type=jnp.float32)
            + b2_ref[...]
        )

        # Final layer has output width 1: a full MXU pass would be ~99% idle,
        # so do a VPU multiply + XLU row-reduce.  Produce the result directly
        # in the lane-dense (block_rows, 128) layout:
        #   (tm, h2) --major-dim split (free)--> (tm//128, 128, h2) --sum(-1)-->
        #   (tm//128, 128), where local row index = r*128 + c.
        s = h2 * w3_ref[...]                                    # (tm, h2_p) VPU
        s = s.reshape(block_rows, 128, s.shape[-1])             # layout-free
        v = jnp.sum(s, axis=-1) + b3_ref[0, 0]                  # (tm//128, 128)
        o_ref[...] = v[None].astype(o_ref.dtype)                # (1, tm//128, 128)

    return kernel


def _choose_tile(n, block_m):
    """Batch tile: multiple of 128, <= block_m, and (for v7x) small enough that
    the grid has >= 2 steps whenever the batch allows it (so the "parallel"
    batch axis can shard across both TensorCores)."""
    n_ceil = _round_up(max(n, 1), 128)
    half = _round_up(pl.cdiv(n_ceil, 2), 128)
    tm = max(128, min(_round_up(block_m, 128), half))
    return tm


def critic_forward(obs, params, activation=jnp.tanh, block_m=1024,
                   matmul_dtype=jnp.float32):
    """obs: (n, obs_dim) float32. Returns value estimates of shape (n,)."""
    w1, b1, w2, b2, w3, b3 = params
    n, obs_dim = obs.shape
    h1_dim = w1.shape[1]
    h2_dim = w2.shape[1]

    if n == 0:  # empty batch: avoid a zero-sized grid
        return jnp.zeros((0,), jnp.float32)

    # ---- batch tiling: big tile, multiple of 128, pad batch to a tile multiple
    tm = _choose_tile(n, block_m)
    n_pad = _round_up(n, tm)
    if n_pad != n:
        obs = jnp.pad(obs, ((0, n_pad - n), (0, 0)))
    grid = (n_pad // tm,)
    block_rows = tm // 128

    # ---- lane-pad hidden dims to multiples of 128 (exact: pads are zeros) ----
    h1_p = _round_up(h1_dim, 128)
    h2_p = _round_up(h2_dim, 128)
    w1p = jnp.pad(w1, ((0, 0), (0, h1_p - h1_dim))).astype(matmul_dtype)
    b1p = jnp.pad(b1, ((0, 0), (0, h1_p - h1_dim)))
    w2p = jnp.pad(w2, ((0, h1_p - h1_dim), (0, h2_p - h2_dim))).astype(matmul_dtype)
    b2p = jnp.pad(b2, ((0, 0), (0, h2_p - h2_dim)))
    # Final-layer weight as a (1, h2_p) f32 row so the kernel can VPU-reduce it.
    w3_row = jnp.pad(w3.reshape(1, h2_dim), ((0, 0), (0, h2_p - h2_dim)))
    b3s = b3.reshape(1, 1)

    # Weights/biases: full-array blocks, same block index every step -> loaded
    # into VMEM once and kept resident across the batch grid.
    def resident(a):
        return pl.BlockSpec(a.shape, lambda i: (0,) * a.ndim)

    # ---- VMEM budget (explicit: v5e default scoped limit is only ~16 MiB) ----
    weight_bytes = sum(int(a.size) * a.dtype.itemsize
                       for a in (w1p, b1p, w2p, b2p, w3_row))
    need = (2 * tm * obs_dim * 4              # obs tile, double-buffered
            + 2 * weight_bytes                # resident weights (2 buffers)
            + 4 * tm * (h1_p + 3 * h2_p)      # h1/h2/s VMEM temporaries
            + 2 * tm * 4)                     # lane-dense output blocks
    vmem_limit = int(min(max(2 * need, 32 * 1024 * 1024), 64 * 1024 * 1024))

    # ---- advisory cost estimate for the XLA scheduler ----
    cost = pl.CostEstimate(
        flops=int(2 * n_pad * (obs_dim * h1_p + h1_p * h2_p + h2_p)),
        transcendentals=int(n_pad * (h1_p + h2_p)),
        bytes_accessed=int(n_pad * obs_dim * 4 + weight_bytes + n_pad * 4),
    )

    out = pl.pallas_call(
        _make_critic_kernel(activation, block_rows, matmul_dtype),
        # Lane-dense output: grid-step i owns slab i of shape (tm//128, 128);
        # flattening row-major recovers batch order (row = i*tm + r*128 + c).
        out_shape=jax.ShapeDtypeStruct((n_pad // tm, block_rows, 128), jnp.float32),
        grid=grid,
        in_specs=[
            pl.BlockSpec((tm, obs_dim), lambda i: (i, 0)),       # obs: streamed tiles
            resident(w1p), resident(b1p),
            resident(w2p), resident(b2p),
            resident(w3_row),
            pl.BlockSpec(memory_space=pltpu.MemorySpace.SMEM),   # scalar output bias
        ],
        out_specs=pl.BlockSpec((1, block_rows, 128), lambda i: (i, 0, 0)),
        compiler_params=pltpu.CompilerParams(
            dimension_semantics=("parallel",),
            vmem_limit_bytes=vmem_limit,
        ),
        cost_estimate=cost,
    )(obs, w1p, b1p, w2p, b2p, w3_row, b3s)

    # torch.squeeze(v_net(obs), -1) -> (n,); drop any batch padding.
    return out.reshape(n_pad)[:n]


def init_critic_params(key, obs_dim, hidden_sizes):
    """Deterministic init matching nn.Linear shapes: W[i]: (in, out), b[i]: (1, out)."""
    sizes = [obs_dim] + list(hidden_sizes) + [1]
    params = []
    keys = jax.random.split(key, 2 * (len(sizes) - 1))
    for i in range(len(sizes) - 1):
        fan_in, fan_out = sizes[i], sizes[i + 1]
        bound = 1.0 / jnp.sqrt(fan_in)
        w = jax.random.uniform(keys[2 * i], (fan_in, fan_out), jnp.float32, -bound, bound)
        b = jax.random.uniform(keys[2 * i + 1], (1, fan_out), jnp.float32, -bound, bound)
        params += [w, b]
    return tuple(params)


def critic_reference(obs, params, activation=jnp.tanh):
    """Plain-JAX reference for correctness check."""
    w1, b1, w2, b2, w3, b3 = params
    h1 = activation(obs @ w1 + b1)
    h2 = activation(h1 @ w2 + b2)
    return jnp.squeeze(h2 @ w3 + b3, axis=-1)


if __name__ == "__main__":
    key = jax.random.PRNGKey(0)
    k_obs, k_params = jax.random.split(key)

    # Small, module-consistent shapes for the smoke test. (For real RL batches
    # the same wrapper streams thousands of rows with 1024-row tiles; benchmark
    # there with an xprof trace, not at n=8.)
    n, obs_dim, hidden_sizes = 8, 32, (64, 64)
    obs = jax.random.normal(k_obs, (n, obs_dim), dtype=jnp.float32)
    params = init_critic_params(k_params, obs_dim, hidden_sizes)

    v = critic_forward(obs, params)
    jax.block_until_ready(v)

    v_ref = critic_reference(obs, params)
    assert v.shape == (n,), f"bad output shape {v.shape}"
    assert jnp.allclose(v, v_ref, atol=1e-5, rtol=1e-5), "mismatch vs reference"

    # Ragged batch: exercises padding, the multi-step grid and the v7x
    # ">= 2 tiles" clamp (here tm=640, grid=(2,)).
    n2 = 1037
    obs2 = jax.random.normal(jax.random.PRNGKey(1), (n2, obs_dim), dtype=jnp.float32)
    v2 = critic_forward(obs2, params)
    jax.block_until_ready(v2)
    assert v2.shape == (n2,)
    assert jnp.allclose(v2, critic_reference(obs2, params), atol=1e-5, rtol=1e-5)

    print("KERNEL_OK")
</pallas_src>

<mosaic_0001>
module attributes {stable_mosaic.version = 11 : i64} {
  func.func @kernel(%arg0: i32, %arg1: memref<128x32xf32, #tpu.memory_space<vmem>>, %arg2: memref<32x128xf32, #tpu.memory_space<vmem>>, %arg3: memref<1x128xf32, #tpu.memory_space<vmem>>, %arg4: memref<128x128xf32, #tpu.memory_space<vmem>>, %arg5: memref<1x128xf32, #tpu.memory_space<vmem>>, %arg6: memref<1x128xf32, #tpu.memory_space<vmem>>, %arg7: memref<1x1xf32, #tpu.memory_space<smem>>, %arg8: memref<1x1x128xf32, #tpu.memory_space<vmem>>) attributes {dimension_semantics = [#tpu.dimension_semantics<parallel>], iteration_bounds = array<i64: 1>, scalar_prefetch = 0 : i64, scratch_operands = 0 : i64, tpu.core_type = #tpu.core_type<tc>, window_params = [{transform_indices = @transform_0, window_bounds = array<i64: 128, 32>}, {pipeline_mode = #tpu.pipeline_mode<synchronous>, transform_indices = @transform_1, window_bounds = array<i64: 32, 128>}, {pipeline_mode = #tpu.pipeline_mode<synchronous>, transform_indices = @transform_2, window_bounds = array<i64: 1, 128>}, {pipeline_mode = #tpu.pipeline_mode<synchronous>, transform_indices = @transform_3, window_bounds = array<i64: 128, 128>}, {pipeline_mode = #tpu.pipeline_mode<synchronous>, transform_indices = @transform_4, window_bounds = array<i64: 1, 128>}, {pipeline_mode = #tpu.pipeline_mode<synchronous>, transform_indices = @transform_5, window_bounds = array<i64: 1, 128>}, {transform_indices = @transform_6, window_bounds = array<i64: 1, 1>}, {transform_indices = @transform_7, window_bounds = array<i64: 1, 1, 128>}]} {
    %c0 = arith.constant 0 : index
    %c0_0 = arith.constant 0 : index
    %0 = vector.load %arg1[%c0, %c0_0] : memref<128x32xf32, #tpu.memory_space<vmem>>, vector<128x32xf32>
    %c0_1 = arith.constant 0 : index
    %c0_2 = arith.constant 0 : index
    %1 = vector.load %arg2[%c0_1, %c0_2] : memref<32x128xf32, #tpu.memory_space<vmem>>, vector<32x128xf32>
    %cst = arith.constant dense<0.000000e+00> : vector<128x128xf32>
    %2 = tpu.matmul %0, %1, %cst {dimension_numbers = #tpu.dot_dimension_numbers<[1], [0], [0], [1], [0, 0, 1, 1], [], []>} : vector<128x32xf32>, vector<32x128xf32>, vector<128x128xf32> -> vector<128x128xf32>
    %c0_3 = arith.constant 0 : index
    %c0_4 = arith.constant 0 : index
    %3 = vector.load %arg3[%c0_3, %c0_4] : memref<1x128xf32, #tpu.memory_space<vmem>>, vector<1x128xf32>
    %4 = vector.broadcast %3 : vector<1x128xf32> to vector<128x128xf32>
    %5 = arith.addf %2, %4 : vector<128x128xf32>
    %6 = math.tanh %5 : vector<128x128xf32>
    %c0_5 = arith.constant 0 : index
    %c0_6 = arith.constant 0 : index
    %7 = vector.load %arg4[%c0_5, %c0_6] : memref<128x128xf32, #tpu.memory_space<vmem>>, vector<128x128xf32>
    %cst_7 = arith.constant dense<0.000000e+00> : vector<128x128xf32>
    %8 = tpu.matmul %6, %7, %cst_7 {dimension_numbers = #tpu.dot_dimension_numbers<[1], [0], [0], [1], [0, 0, 1, 1], [], []>} : vector<128x128xf32>, vector<128x128xf32>, vector<128x128xf32> -> vector<128x128xf32>
    %c0_8 = arith.constant 0 : index
    %c0_9 = arith.constant 0 : index
    %9 = vector.load %arg5[%c0_8, %c0_9] : memref<1x128xf32, #tpu.memory_space<vmem>>, vector<1x128xf32>
    %10 = vector.broadcast %9 : vector<1x128xf32> to vector<128x128xf32>
    %11 = arith.addf %8, %10 : vector<128x128xf32>
    %12 = math.tanh %11 : vector<128x128xf32>
    %c0_10 = arith.constant 0 : index
    %c0_11 = arith.constant 0 : index
    %13 = vector.load %arg6[%c0_10, %c0_11] : memref<1x128xf32, #tpu.memory_space<vmem>>, vector<1x128xf32>
    %14 = vector.broadcast %13 : vector<1x128xf32> to vector<128x128xf32>
    %15 = arith.mulf %12, %14 : vector<128x128xf32>
    %16 = vector.shape_cast %15 : vector<128x128xf32> to vector<1x128x128xf32>
    %cst_12 = arith.constant dense<0.000000e+00> : vector<1x128xf32>
    %17 = vector.multi_reduction <add>, %16, %cst_12 [2] : vector<1x128x128xf32> to vector<1x128xf32>
    %c0_13 = arith.constant 0 : index
    %c0_14 = arith.constant 0 : index
    %18 = memref.load %arg7[%c0_13, %c0_14] : memref<1x1xf32, #tpu.memory_space<smem>>
    %19 = vector.broadcast %18 : f32 to vector<1x128xf32>
    %20 = arith.addf %17, %19 : vector<1x128xf32>
    %21 = vector.shape_cast %20 : vector<1x128xf32> to vector<1x1x128xf32>
    %c0_15 = arith.constant 0 : index
    %c0_16 = arith.constant 0 : index
    %c0_17 = arith.constant 0 : index
    %22 = vector.load %arg8[%c0_15, %c0_16, %c0_17] : memref<1x1x128xf32, #tpu.memory_space<vmem>>, vector<1x1x128xf32>
    tpu.vector_store %arg8[%c0_15, %c0_16, %c0_17], %21 {strides = array<i32>} : memref<1x1x128xf32, #tpu.memory_space<vmem>>, vector<1x1x128xf32>,
    return
  }
  func.func @transform_0(%arg0: i32) -> (i32, i32) {
    %c0_i32 = arith.constant 0 : i32
    %c0_i32_0 = arith.constant 0 : i32
    return %arg0, %c0_i32 : i32, i32
  }
  func.func @transform_1(%arg0: i32) -> (i32, i32) {
    %c0_i32 = arith.constant 0 : i32
    %c0_i32_0 = arith.constant 0 : i32
    %c0_i32_1 = arith.constant 0 : i32
    return %c0_i32, %c0_i32_0 : i32, i32
  }
  func.func @transform_2(%arg0: i32) -> (i32, i32) {
    %c0_i32 = arith.constant 0 : i32
    %c0_i32_0 = arith.constant 0 : i32
    %c0_i32_1 = arith.constant 0 : i32
    return %c0_i32, %c0_i32_0 : i32, i32
  }
  func.func @transform_3(%arg0: i32) -> (i32, i32) {
    %c0_i32 = arith.constant 0 : i32
    %c0_i32_0 = arith.constant 0 : i32
    %c0_i32_1 = arith.constant 0 : i32
    return %c0_i32, %c0_i32_0 : i32, i32
  }
  func.func @transform_4(%arg0: i32) -> (i32, i32) {
    %c0_i32 = arith.constant 0 : i32
    %c0_i32_0 = arith.constant 0 : i32
    %c0_i32_1 = arith.constant 0 : i32
    return %c0_i32, %c0_i32_0 : i32, i32
  }
  func.func @transform_5(%arg0: i32) -> (i32, i32) {
    %c0_i32 = arith.constant 0 : i32
    %c0_i32_0 = arith.constant 0 : i32
    %c0_i32_1 = arith.constant 0 : i32
    return %c0_i32, %c0_i32_0 : i32, i32
  }
  func.func @transform_6(%arg0: i32) -> (i32, i32) {
    %c0_i32 = arith.constant 0 : i32
    %c0_i32_0 = arith.constant 0 : i32
    %c0_i32_1 = arith.constant 0 : i32
    return %c0_i32, %c0_i32_0 : i32, i32
  }
  func.func @transform_7(%arg0: i32) -> (i32, i32, i32) {
    %c0_i32 = arith.constant 0 : i32
    %c0_i32_0 = arith.constant 0 : i32
    %c0_i32_1 = arith.constant 0 : i32
    return %arg0, %c0_i32, %c0_i32_0 : i32, i32, i32
  }
}

</mosaic_0001>

<bundles_post_ra>
// kernel: tpu_custom_call.1
= control target key start
LH: loop header
LB: loop body
LE: loop exit
PB: predicated region body
PF: predicated region fallthrough
CT: control target
= control target key end

     0   :  { %s876_s0 = inlined_call_operand.vmem [shape: f32[128,32], index: 0, kind: input, shape index: {}]   ;;  %s877_s1 = inlined_call_operand.vmem [shape: f32[32,128], index: 1, kind: input, shape index: {}]   ;;  %s878_s2 = inlined_call_operand.vmem [shape: f32[1,128], index: 2, kind: input, shape index: {}]   ;;  %s879_s3 = inlined_call_operand.vmem [shape: f32[128,128], index: 3, kind: input, shape index: {}]   ;;  %s880_s4 = inlined_call_operand.vmem [shape: f32[1,128], index: 4, kind: input, shape index: {}]   ;;  %s881_s5 = inlined_call_operand.vmem [shape: f32[1,128], index: 5, kind: input, shape index: {}]   ;;  %s882_s6 = inlined_call_operand.<no memory space> [shape: f32[1,1], index: 6, kind: input, shape index: {}]   ;;  %s883_s7 = inlined_call_operand.hbm [shape: f32[1,1,128], index: 7, kind: output, shape index: {}]  }
   0x1   :  { %v47_v0 = vld [vmem:[%s877_s1 + $0x18] sm:$0xff]  ;;  %v46_v1 = vld [vmem:[%s877_s1 + $0x10] sm:$0xff]  ;;  %v45_v2 = vld [vmem:[%s877_s1 + $0x8] sm:$0xff] }
   0x2   :  { %113 = vmatpush.msra.mxu0 %v47_v0  ;;  %466 = vmatpush.msra.mxu3 %v47_v0  ;;  %v44_v3 = vld [vmem:[%s877_s1] sm:$0xff] }
   0x4   :  { %114 = vmatpush.msra.mxu0 %v46_v1  ;;  %467 = vmatpush.msra.mxu3 %v46_v1 }
   0x5   :  { %13 = vsyncpa [#allocation4], 0  ;;  %v28_v4 = vld [vmem:[%s876_s0] sm:$0xff]  ;;  %vm52_vm0 = vcmask 261120   ;;  %v29_v5 = vld [vmem:[%s876_s0 + $0x8] sm:$0xff]  ;;  %vm374_vm1 = vcmask 130112  }
   0x6   :  { %115 = vmatpush.msra.mxu0 %v45_v2  ;;  %468 = vmatpush.msra.mxu3 %v45_v2  ;;  %v30_v6 = vld [vmem:[%s876_s0 + $0x10] sm:$0xff]  ;;  %v31_v7 = vld [vmem:[%s876_s0 + $0x18] sm:$0xff]  ;;  %v32_v9 = vld [vmem:[%s876_s0 + $0x20] sm:$0xff]  ;;  %vm378_vm2 = vcmask 195712   ;;  %vm382_vm3 = vcmask 261312   ;;  %vm386_vm4 = vcmask 326912  }
   0x7   :  { %v38_v8 = vld [vmem:[%s876_s0 + $0x50] sm:$0xff]  ;;  %v39_v10 = vld [vmem:[%s876_s0 + $0x58] sm:$0xff]  ;;  %v33_v11 = vld [vmem:[%s876_s0 + $0x28] sm:$0xff]  ;;  %vm390_vm5 = vcmask 392512   ;;  %vm394_vm6 = vcmask 458112   ;;  %vm398_vm7 = vcmask 523712  }
   0x8   :  { %116 = vmatpush.msra.mxu0 %v44_v3  ;;  %469 = vmatpush.msra.mxu3 %v44_v3  ;;  %v40_v12 = vld [vmem:[%s876_s0 + $0x60] sm:$0xff]  ;;  %v197_v13 = vld [vmem:[%s879_s3 + $0x78] sm:$0xff]  ;;  %v196_v14 = vld [vmem:[%s879_s3 + $0x70] sm:$0xff]  ;;  %vm402_vm8 = vcmask 589312   ;;  %vm406_vm9 = vcmask 654912   ;;  %vm410_vm10 = vcmask 720512  }
   0x9   :  { %450 = vmatmul.msk.f32.vlgmr.msra.gmra.mxu0 %vm52_vm0, %v28_v4  ;;  %460 = vmatmul.msk.f32.vlgmr.msra.gmra.mxu3 %vm52_vm0, %v38_v8  ;;  %v195_v15 = vld [vmem:[%s879_s3 + $0x68] sm:$0xff]  ;;  %v34_v16 = vld [vmem:[%s876_s0 + $0x30] sm:$0xff]  ;;  %v194_v17 = vld [vmem:[%s879_s3 + $0x60] sm:$0xff]  ;;  %vm414_vm11 = vcmask 786112   ;;  %vm418_vm12 = vcmask 851712   ;;  %vm422_vm13 = vcmask 917312  }
   0xa   :  { %202 = vmatpush.msra.mxu1 %v197_v13  ;;  %470 = vmatpush.msra.mxu2 %v197_v13  ;;  %v41_v18 = vld [vmem:[%s876_s0 + $0x68] sm:$0xff]  ;;  %v193_v19 = vld [vmem:[%s879_s3 + $0x58] sm:$0xff]  ;;  %v192_v20 = vld [vmem:[%s879_s3 + $0x50] sm:$0xff]  ;;  %vm426_vm14 = vcmask 982912   ;;  %s441_s30 = sshll.u32 %s883_s7, 4  ;;  %vm430_vm15 = vcmask 1048512   ;;  %s442_s30 = int_to_ptr.hbm [resolvable:$true] %s441_s30 }
   0xb   :  { %471 = vmatpush.msrb.mxu3 %v197_v13  ;;  %v191_v21 = vld [vmem:[%s879_s3 + $0x48] sm:$0xff]  ;;  %v35_v22 = vld [vmem:[%s876_s0 + $0x38] sm:$0xff]  ;;  %v190_v23 = vld [vmem:[%s879_s3 + $0x40] sm:$0xff] }
   0xc   :  { %203 = vmatpush.msra.mxu1 %v196_v14  ;;  %472 = vmatpush.msra.mxu2 %v196_v14  ;;  %v42_v24 = vld [vmem:[%s876_s0 + $0x70] sm:$0xff]  ;;  %v189_v25 = vld [vmem:[%s879_s3 + $0x38] sm:$0xff]  ;;  %v187_v27 = vld [vmem:[%s879_s3 + $0x28] sm:$0xff] }
   0xd   :  { %473 = vmatpush.msrb.mxu3 %v196_v14  ;;  %v188_v26 = vld [vmem:[%s879_s3 + $0x30] sm:$0xff]  ;;  %v36_v28 = vld [vmem:[%s876_s0 + $0x40] sm:$0xff]  ;;  %v43_v29 = vld [vmem:[%s876_s0 + $0x78] sm:$0xff] }
   0xe   :  { %204 = vmatpush.msra.mxu1 %v195_v15  ;;  %474 = vmatpush.msra.mxu2 %v195_v15  ;;  %v37_v30 = vld [vmem:[%s876_s0 + $0x48] sm:$0xff]  ;;  %v186_v31 = vld [vmem:[%s879_s3 + $0x20] sm:$0xff]  ;;  %v185_v32 = vld [vmem:[%s879_s3 + $0x18] sm:$0xff] }
   0xf   :  { %475 = vmatpush.msrb.mxu3 %v195_v15  ;;  %v184_v33 = vld [vmem:[%s879_s3 + $0x10] sm:$0xff]  ;;  %v183_v34 = vld [vmem:[%s879_s3 + $0x8] sm:$0xff]  ;;  %v182_v35 = vld [vmem:[%s879_s3] sm:$0xff] }
  0x10   :  { %205 = vmatpush.msra.mxu1 %v194_v17  ;;  %476 = vmatpush.msra.mxu2 %v194_v17  ;;  %v764_v36 = vld [vmem:[%s878_s2] ss:$0 sm:$0xff] }
  0x11   :  { %451 = vmatmul.msk.f32.gmra.mxu0 %vm52_vm0, %v29_v5  ;;  %461 = vmatmul.msk.f32.gmra.mxu3 %vm52_vm0, %v39_v10 }
  0x12   :  { %206 = vmatpush.msra.mxu1 %v193_v19  ;;  %477 = vmatpush.msrb.mxu3 %v194_v17 }
  0x13   :  { %478 = vmatpush.msra.mxu2 %v193_v19 }
  0x14   :  { %207 = vmatpush.msra.mxu1 %v192_v20  ;;  %479 = vmatpush.msrb.mxu3 %v193_v19 }
  0x15   :  { %480 = vmatpush.msra.mxu2 %v192_v20 }
  0x16   :  { %208 = vmatpush.msra.mxu1 %v191_v21  ;;  %481 = vmatpush.msrb.mxu3 %v192_v20 }
  0x17   :  { %482 = vmatpush.msra.mxu2 %v191_v21 }
  0x18   :  { %209 = vmatpush.msra.mxu1 %v190_v23  ;;  %483 = vmatpush.msrb.mxu3 %v191_v21  ;;  %v785_v21 = vld [vmem:[%s880_s4] ss:$0 sm:$0xff] }
  0x19   :  { %452 = vmatmul.msk.f32.gmra.mxu0 %vm52_vm0, %v30_v6  ;;  %462 = vmatmul.msk.f32.gmra.mxu3 %vm52_vm0, %v40_v12 }
  0x1a   :  { %484 = vmatpush.msra.mxu2 %v190_v23  ;;  %210 = vmatpush.msra.mxu1 %v189_v25 }
  0x1b   :  { %485 = vmatpush.msrb.mxu3 %v190_v23 }
  0x1c   :  { %486 = vmatpush.msra.mxu2 %v189_v25  ;;  %211 = vmatpush.msra.mxu1 %v188_v26 }
  0x1d   :  { %487 = vmatpush.msrb.mxu3 %v189_v25 }
  0x1e   :  { %488 = vmatpush.msra.mxu2 %v188_v26  ;;  %212 = vmatpush.msra.mxu1 %v187_v27 }
  0x1f   :  { %489 = vmatpush.msrb.mxu3 %v188_v26 }
  0x20   :  { %490 = vmatpush.msra.mxu2 %v187_v27  ;;  %213 = vmatpush.msra.mxu1 %v186_v31 }
  0x21   :  { %453 = vmatmul.msk.f32.gmra.mxu0 %vm52_vm0, %v31_v7  ;;  %463 = vmatmul.msk.f32.gmra.mxu3 %vm52_vm0, %v41_v18 }
  0x22   :  { %491 = vmatpush.msrb.mxu3 %v187_v27  ;;  %492 = vmatpush.msra.mxu2 %v186_v31 }
  0x23   :  { %214 = vmatpush.msra.mxu1 %v185_v32 }
  0x24   :  { %493 = vmatpush.msrb.mxu3 %v186_v31  ;;  %494 = vmatpush.msra.mxu2 %v185_v32 }
  0x25   :  { %215 = vmatpush.msra.mxu1 %v184_v33 }
  0x26   :  { %495 = vmatpush.msrb.mxu3 %v185_v32  ;;  %496 = vmatpush.msra.mxu2 %v184_v33 }
  0x27   :  { %216 = vmatpush.msra.mxu1 %v183_v34 }
  0x28   :  { %497 = vmatpush.msrb.mxu3 %v184_v33  ;;  %498 = vmatpush.msra.mxu2 %v183_v34 }
  0x29   :  { %454 = vmatmul.msk.f32.gmra.mxu0 %vm52_vm0, %v32_v9  ;;  %464 = vmatmul.msk.f32.gmra.mxu3 %vm52_vm0, %v42_v24  ;;  %v791_v24 = vld [vmem:[%s881_s5] ss:$0 sm:$0xff] }
  0x2a   :  { %499 = vmatpush.msrb.mxu3 %v183_v34  ;;  %217 = vmatpush.msra.mxu1 %v182_v35 }
  0x2b   :  { %500 = vmatpush.msra.mxu2 %v182_v35 }
  0x2c   :  { %501 = vmatpush.msrb.mxu3 %v182_v35 }
  0x31   :  { %455 = vmatmul.msk.f32.gmra.mxu0 %vm52_vm0, %v33_v11  ;;  %465 = vmatmul.msk.f32.gmra.mxu3 %vm52_vm0, %v43_v29 }
  0x39   :  { %456 = vmatmul.msk.f32.gmra.mxu0 %vm52_vm0, %v34_v16 }
  0x41   :  { %457 = vmatmul.msk.f32.gmra.mxu0 %vm52_vm0, %v35_v22 }
  0x49   :  { %458 = vmatmul.msk.f32.gmra.mxu0 %vm52_vm0, %v36_v28 }
  0x51   :  { %459 = vmatmul.msk.f32.gmra.mxu0 %vm52_vm0, %v37_v30 }
  0x86   :  { %v118_v37 = vpop.f32.mrf.mxu0 }
  0x87   :  { %v119_v38 = vadd.f32 %v764_v36, %v118_v37 }
  0x89   :  { %506 = vtanh.f32 %v119_v38 }
  0x8c   :  { %v148_v51 = vpop.f32.mrf.mxu3 }
  0x8d   :  { %v149_v11 = vadd.f32 %v764_v36, %v148_v51 }
  0x8e   :  { %v121_v39 = vpop.f32.mrf.mxu0 }
  0x8f   :  { %v507_v40 = vpop.eup %506  ;;  %v122_v41 = vadd.f32 %v764_v36, %v121_v39 }
  0x90   :  { %218 = vmatmul.f32.vlgmr.msra.gmra.mxu1 %v507_v40 }
  0x91   :  { %508 = vtanh.f32 %v122_v41 }
  0x94   :  { %v151_v55 = vpop.f32.mrf.mxu3 }
  0x95   :  { %v152_v14 = vadd.f32 %v764_v36, %v151_v55 }
  0x96   :  { %v124_v42 = vpop.f32.mrf.mxu0 }
  0x97   :  { %v509_v43 = vpop.eup %508  ;;  %v125_v44 = vadd.f32 %v764_v36, %v124_v42 }
  0x98   :  { %221 = vmatmul.f32.gmra.mxu1 %v509_v43 }
  0x99   :  { %510 = vtanh.f32 %v125_v44 }
  0x9c   :  { %v154_v59 = vpop.f32.mrf.mxu3 }
  0x9d   :  { %v155_v16 = vadd.f32 %v764_v36, %v154_v59 }
  0x9e   :  { %v127_v45 = vpop.f32.mrf.mxu0 }
  0x9f   :  { %v511_v46 = vpop.eup %510  ;;  %v128_v47 = vadd.f32 %v764_v36, %v127_v45 }
  0xa0   :  { %224 = vmatmul.f32.gmra.mxu1 %v511_v46 }
  0xa1   :  { %512 = vtanh.f32 %v128_v47 }
  0xa4   :  { %v157_v63 = vpop.f32.mrf.mxu3 }
  0xa5   :  { %v158_v18 = vadd.f32 %v764_v36, %v157_v63 }
  0xa6   :  { %v130_v48 = vpop.f32.mrf.mxu0 }
  0xa7   :  { %v513_v49 = vpop.eup %512  ;;  %v131_v50 = vadd.f32 %v764_v36, %v130_v48 }
  0xa8   :  { %227 = vmatmul.f32.gmra.mxu1 %v513_v49 }
  0xa9   :  { %514 = vtanh.f32 %v131_v50 }
  0xac   :  { %v160_v3 = vpop.f32.mrf.mxu3 }
  0xad   :  { %v161_v4 = vadd.f32 %v764_v36, %v160_v3 }
  0xae   :  { %v133_v52 = vpop.f32.mrf.mxu0 }
  0xaf   :  { %v515_v53 = vpop.eup %514  ;;  %v134_v54 = vadd.f32 %v764_v36, %v133_v52 }
  0xb0   :  { %230 = vmatmul.f32.gmra.mxu1 %v515_v53 }
  0xb1   :  { %516 = vtanh.f32 %v134_v54 }
  0xb4   :  { %v163_v8 = vpop.f32.mrf.mxu3 }
  0xb5   :  { %v164_v10 = vadd.f32 %v764_v36, %v163_v8 }
  0xb6   :  { %v136_v56 = vpop.f32.mrf.mxu0 }
  0xb7   :  { %v517_v57 = vpop.eup %516  ;;  %v137_v58 = vadd.f32 %v764_v36, %v136_v56 }
  0xb8   :  { %233 = vmatmul.f32.gmra.mxu1 %v517_v57 }
  0xb9   :  { %518 = vtanh.f32 %v137_v58 }
  0xbe   :  { %v139_v60 = vpop.f32.mrf.mxu0 }
  0xbf   :  { %v519_v61 = vpop.eup %518  ;;  %v140_v62 = vadd.f32 %v764_v36, %v139_v60 }
  0xc0   :  { %236 = vmatmul.f32.gmra.mxu1 %v519_v61 }
  0xc1   :  { %520 = vtanh.f32 %v140_v62 }
  0xc6   :  { %v142_v0 = vpop.f32.mrf.mxu0 }
  0xc7   :  { %v521_v1 = vpop.eup %520  ;;  %v143_v2 = vadd.f32 %v764_v36, %v142_v0 }
  0xc8   :  { %239 = vmatmul.f32.vlgmr.msra.gmra.mxu2 %v521_v1 }
  0xc9   :  { %522 = vtanh.f32 %v143_v2 }
  0xca   :  { %524 = vtanh.f32 %v161_v4 }
  0xce   :  { %v145_v5 = vpop.f32.mrf.mxu0 }
  0xcf   :  { %v523_v6 = vpop.eup %522  ;;  %v146_v7 = vadd.f32 %v764_v36, %v145_v5 }
  0xd0   :  { %242 = vmatmul.f32.gmra.mxu2 %v523_v6  ;;  %v525_v9 = vpop.eup %524 }
  0xd1   :  { %526 = vtanh.f32 %v146_v7  ;;  %260 = vmatmul.f32.vlgmr.msrb.gmra.mxu3 %v525_v9 }
  0xd2   :  { %528 = vtanh.f32 %v164_v10 }
  0xd3   :  { %530 = vtanh.f32 %v149_v11 }
  0xd4   :  { %532 = vtanh.f32 %v152_v14 }
  0xd5   :  { %534 = vtanh.f32 %v155_v16 }
  0xd6   :  { %536 = vtanh.f32 %v158_v18 }
  0xd7   :  { %v527_v12 = vpop.eup %526 }
  0xd8   :  { %245 = vmatmul.f32.gmra.mxu2 %v527_v12  ;;  %v529_v13 = vpop.eup %528 }
  0xd9   :  { %263 = vmatmul.f32.gmra.mxu3 %v529_v13  ;;  %v531_v15 = vpop.eup %530 }
  0xda   :  { %v533_v17 = vpop.eup %532 }
  0xdb   :  { %v535_v19 = vpop.eup %534 }
  0xdc   :  { %v537_v20 = vpop.eup %536 }
  0xe0   :  { %248 = vmatmul.f32.gmra.mxu2 %v531_v15 }
  0xe8   :  { %251 = vmatmul.f32.gmra.mxu2 %v533_v17 }
  0xf0   :  { %254 = vmatmul.f32.gmra.mxu2 %v535_v19 }
  0xf8   :  { %257 = vmatmul.f32.gmra.mxu2 %v537_v20 }
 0x10d   :  { %v219_v22 = vpop.f32.mrf.mxu1 }
 0x10e   :  { %v220_v23 = vadd.f32 %v785_v21, %v219_v22 }
 0x110   :  { %538 = vtanh.f32 %v220_v23 }
 0x115   :  { %v222_v25 = vpop.f32.mrf.mxu1 }
 0x116   :  { %v539_v26 = vpop.eup %538  ;;  %v223_v27 = vadd.f32 %v785_v21, %v222_v25 }
 0x117   :  { %v287_v28 = vmul.f32 %v539_v26, %v791_v24 }
 0x118   :  { %540 = vtanh.f32 %v223_v27 }
 0x119   :  { %303 = vadd.xlane.f32.xlu0 %v287_v28 }
 0x11d   :  { %v225_v29 = vpop.f32.mrf.mxu1 }
 0x11e   :  { %v541_v30 = vpop.eup %540  ;;  %v226_v31 = vadd.f32 %v785_v21, %v225_v29 }
 0x11f   :  { %v288_v32 = vmul.f32 %v541_v30, %v791_v24 }
 0x120   :  { %542 = vtanh.f32 %v226_v31  ;;  %v369_v31 = vlaneseq }
 0x121   :  { %305 = vadd.xlane.f32.xlu0 %v288_v32 }
 0x122   :  { %v824_v32 = vand.u32 127, %v369_v31 }
 0x125   :  { %v228_v33 = vpop.f32.mrf.mxu1 }
 0x126   :  { %v543_v34 = vpop.eup %542  ;;  %v229_v35 = vadd.f32 %v785_v21, %v228_v33 }
 0x127   :  { %v289_v36 = vmul.f32 %v543_v34, %v791_v24  ;;  %v829_v34 = vstv %s882_s6  ;;  %s596_s6 = smov [#allocation3]  }
 0x128   :  { %544 = vtanh.f32 %v229_v35  ;;  %s439_s27 = sshll.u32 %s596_s6, 4  ;;  %s440_s27 = int_to_ptr.vmem [resolvable:$true] %s439_s27 }
 0x129   :  { %307 = vadd.xlane.f32.xlu1 %v289_v36 }
 0x12d   :  { %v231_v37 = vpop.f32.mrf.mxu1 }
 0x12e   :  { %v545_v38 = vpop.eup %544  ;;  %v232_v39 = vadd.f32 %v785_v21, %v231_v37 }
 0x12f   :  { %v290_v40 = vmul.f32 %v545_v38, %v791_v24 }
 0x130   :  { %546 = vtanh.f32 %v232_v39  ;;  %v376_v39 = vadd.s32 4294967280, %v824_v32 }
 0x131   :  { %309 = vadd.xlane.f32.xlu1 %v290_v40 }
 0x135   :  { %v234_v41 = vpop.f32.mrf.mxu1 }
 0x136   :  { %v547_v42 = vpop.eup %546  ;;  %v235_v43 = vadd.f32 %v785_v21, %v234_v41 }
 0x137   :  { %v291_v44 = vmul.f32 %v547_v42, %v791_v24  ;;  %v380_v42 = vadd.s32 4294967272, %v824_v32 }
 0x138   :  { %548 = vtanh.f32 %v235_v43 }
 0x139   :  { %311 = vadd.xlane.f32.xlu2 %v291_v44  ;;  %v384_v44 = vadd.s32 4294967264, %v824_v32 }
 0x13d   :  { %v237_v45 = vpop.f32.mrf.mxu1 }
 0x13e   :  { %v549_v46 = vpop.eup %548  ;;  %v238_v47 = vadd.f32 %v785_v21, %v237_v45 }
 0x13f   :  { %v292_v48 = vmul.f32 %v549_v46, %v791_v24 }
 0x140   :  { %550 = vtanh.f32 %v238_v47 }
 0x141   :  { %313 = vadd.xlane.f32.xlu2 %v292_v48  ;;  %v388_v48 = vadd.s32 4294967256, %v824_v32 }
 0x146   :  { %v551_v49 = vpop.eup %550 }
 0x147   :  { %v293_v50 = vmul.f32 %v551_v49, %v791_v24 }
 0x149   :  { %315 = vadd.xlane.f32.xlu0 %v293_v50 }
 0x14b   :  { %v240_v51 = vpop.f32.mrf.mxu2 }
 0x14c   :  { %v241_v52 = vadd.f32 %v785_v21, %v240_v51  ;;  %v392_v51 = vadd.s32 4294967248, %v824_v32 }
 0x14e   :  { %552 = vtanh.f32 %v241_v52 }
 0x153   :  { %v243_v53 = vpop.f32.mrf.mxu2 }
 0x154   :  { %v553_v54 = vpop.eup %552  ;;  %v244_v55 = vadd.f32 %v785_v21, %v243_v53  ;;  %v261_v1 = vpop.f32.mrf.mxu3 }
 0x155   :  { %v294_v56 = vmul.f32 %v553_v54, %v791_v24  ;;  %v262_v6 = vadd.f32 %v785_v21, %v261_v1 }
 0x156   :  { %554 = vtanh.f32 %v244_v55  ;;  %v396_v55 = vadd.s32 4294967240, %v824_v32 }
 0x157   :  { %317 = vadd.xlane.f32.xlu1 %v294_v56 }
 0x15b   :  { %v246_v57 = vpop.f32.mrf.mxu2 }
 0x15c   :  { %v555_v58 = vpop.eup %554  ;;  %v247_v59 = vadd.f32 %v785_v21, %v246_v57  ;;  %v264_v8 = vpop.f32.mrf.mxu3 }
 0x15d   :  { %v295_v60 = vmul.f32 %v555_v58, %v791_v24  ;;  %v265_v12 = vadd.f32 %v785_v21, %v264_v8 }
 0x15e   :  { %556 = vtanh.f32 %v247_v59  ;;  %v400_v59 = vadd.s32 4294967232, %v824_v32 }
 0x15f   :  { %319 = vadd.xlane.f32.xlu2 %v295_v60 }
 0x163   :  { %v249_v61 = vpop.f32.mrf.mxu2 }
 0x164   :  { %v557_v62 = vpop.eup %556  ;;  %v250_v63 = vadd.f32 %v785_v21, %v249_v61 }
 0x165   :  { %v296_v0 = vmul.f32 %v557_v62, %v791_v24 }
 0x166   :  { %558 = vtanh.f32 %v250_v63 }
 0x167   :  { %321 = vadd.xlane.f32.xlu0 %v296_v0  ;;  %v404_v0 = vadd.s32 4294967224, %v824_v32 }
 0x16b   :  { %v252_v2 = vpop.f32.mrf.mxu2 }
 0x16c   :  { %v559_v3 = vpop.eup %558  ;;  %v253_v4 = vadd.f32 %v785_v21, %v252_v2 }
 0x16d   :  { %v297_v5 = vmul.f32 %v559_v3, %v791_v24  ;;  %v408_v3 = vadd.s32 4294967216, %v824_v32 }
 0x16e   :  { %560 = vtanh.f32 %v253_v4 }
 0x16f   :  { %323 = vadd.xlane.f32.xlu1 %v297_v5  ;;  %562 = vtanh.f32 %v262_v6 }
 0x173   :  { %v255_v7 = vpop.f32.mrf.mxu2 }
 0x174   :  { %v561_v9 = vpop.eup %560  ;;  %v256_v10 = vadd.f32 %v785_v21, %v255_v7  ;;  %v412_v7 = vadd.s32 4294967208, %v824_v32 }
 0x175   :  { %v298_v11 = vmul.f32 %v561_v9, %v791_v24  ;;  %v563_v13 = vpop.eup %562 }
 0x176   :  { %564 = vtanh.f32 %v256_v10  ;;  %v301_v15 = vmul.f32 %v563_v13, %v791_v24 }
 0x177   :  { %325 = vadd.xlane.f32.xlu2 %v298_v11  ;;  %566 = vtanh.f32 %v265_v12  ;;  %v416_v11 = vadd.s32 4294967200, %v824_v32 }
 0x17b   :  { %v258_v14 = vpop.f32.mrf.mxu2 }
 0x17c   :  { %v565_v16 = vpop.eup %564  ;;  %v259_v17 = vadd.f32 %v785_v21, %v258_v14 }
 0x17d   :  { %v299_v18 = vmul.f32 %v565_v16, %v791_v24  ;;  %v567_v19 = vpop.eup %566 }
 0x17e   :  { %568 = vtanh.f32 %v259_v17  ;;  %v302_v20 = vmul.f32 %v567_v19, %v791_v24 }
 0x17f   :  { %327 = vadd.xlane.f32.xlu0 %v299_v18  ;;  %331 = vadd.xlane.f32.xlu2 %v301_v15 }
 0x184   :  { %v569_v22 = vpop.eup %568 }
 0x185   :  { %v300_v23 = vmul.f32 %v569_v22, %v791_v24  ;;  %v372_v24 = vadd.s32 4294967288, %v824_v32  ;;  %v428_v22 = vadd.s32 4294967176, %v824_v32 }
 0x187   :  { %329 = vadd.xlane.f32.xlu1 %v300_v23  ;;  %333 = vadd.xlane.f32.xlu0 %v302_v20  ;;  %v420_v20 = vadd.s32 4294967192, %v824_v32 }
 0x18c   :  { %v304_v25 = vpop.xlane.xlu0 %303 }
 0x18d   :  { %v337_v38 = vadd.f32 %v829_v34, %v304_v25 }
 0x18f   :  { %v371_v46 = vperm.slane %v337_v38, %v824_v32 }
 0x194   :  { %v306_v28 = vpop.xlane.xlu0 %305 }
 0x195   :  { %v338_v35 = vadd.f32 %v829_v34, %v306_v28 }
 0x197   :  { %v373_v41 = vperm.slane %v338_v35, %v372_v24 }
 0x199   :  { %v375_v53 = vsel %vm374_vm1, %v373_v41, %v371_v46 }
 0x19c   :  { %v308_v27 = vpop.xlane.xlu1 %307 }
 0x19d   :  { %v339_v40 = vadd.f32 %v829_v34, %v308_v27 }
 0x19f   :  { %v377_v47 = vperm.slane %v339_v40, %v376_v39 }
 0x1a1   :  { %v379_v62 = vsel %vm378_vm2, %v377_v47, %v375_v53 }
 0x1a4   :  { %v310_v30 = vpop.xlane.xlu1 %309 }
 0x1a5   :  { %v340_v43 = vadd.f32 %v829_v34, %v310_v30 }
 0x1a7   :  { %v381_v54 = vperm.slane %v340_v43, %v380_v42 }
 0x1a9   :  { %v383_v5 = vsel %vm382_vm3, %v381_v54, %v379_v62 }
 0x1ac   :  { %v312_v26 = vpop.xlane.xlu2 %311 }
 0x1ad   :  { %v341_v45 = vadd.f32 %v829_v34, %v312_v26  ;;  %v424_v26 = vadd.s32 4294967184, %v824_v32 }
 0x1af   :  { %v385_v58 = vperm.slane %v341_v45, %v384_v44 }
 0x1b1   :  { %v387_v9 = vsel %vm386_vm4, %v385_v58, %v383_v5 }
 0x1b4   :  { %v314_v29 = vpop.xlane.xlu2 %313 }
 0x1b5   :  { %v342_v49 = vadd.f32 %v829_v34, %v314_v29 }
 0x1b7   :  { %v389_v63 = vperm.slane %v342_v49, %v388_v48 }
 0x1b9   :  { %v391_v13 = vsel %vm390_vm5, %v389_v63, %v387_v9 }
 0x1bc   :  { %v316_v21 = vpop.xlane.xlu0 %315 }
 0x1bd   :  { %v343_v52 = vadd.f32 %v829_v34, %v316_v21 }
 0x1bf   :  { %v393_v2 = vperm.slane %v343_v52, %v392_v51 }
 0x1c1   :  { %v395_v16 = vsel %vm394_vm6, %v393_v2, %v391_v13 }
 0x1ca   :  { %v318_v36 = vpop.xlane.xlu1 %317 }
 0x1cb   :  { %v344_v56 = vadd.f32 %v829_v34, %v318_v36 }
 0x1cd   :  { %v397_v6 = vperm.slane %v344_v56, %v396_v55 }
 0x1cf   :  { %v399_v18 = vsel %vm398_vm7, %v397_v6, %v395_v16 }
 0x1d2   :  { %v320_v33 = vpop.xlane.xlu2 %319 }
 0x1d3   :  { %v345_v60 = vadd.f32 %v829_v34, %v320_v33 }
 0x1d5   :  { %v401_v10 = vperm.slane %v345_v60, %v400_v59 }
 0x1d7   :  { %v403_v23 = vsel %vm402_vm8, %v401_v10, %v399_v18 }
 0x1da   :  { %v322_v37 = vpop.xlane.xlu0 %321 }
 0x1db   :  { %v346_v1 = vadd.f32 %v829_v34, %v322_v37 }
 0x1dd   :  { %v405_v14 = vperm.slane %v346_v1, %v404_v0 }
 0x1df   :  { %v407_v30 = vsel %vm406_vm9, %v405_v14, %v403_v23 }
 0x1e2   :  { %v324_v57 = vpop.xlane.xlu1 %323 }
 0x1e3   :  { %v347_v4 = vadd.f32 %v829_v34, %v324_v57 }
 0x1e5   :  { %v409_v17 = vperm.slane %v347_v4, %v408_v3 }
 0x1e7   :  { %v411_v33 = vsel %vm410_vm10, %v409_v17, %v407_v30 }
 0x1ea   :  { %v326_v50 = vpop.xlane.xlu2 %325 }
 0x1eb   :  { %v348_v8 = vadd.f32 %v829_v34, %v326_v50 }
 0x1ed   :  { %v413_v19 = vperm.slane %v348_v8, %v412_v7 }
 0x1ef   :  { %v415_v24 = vsel %vm414_vm11, %v413_v19, %v411_v33 }
 0x1f2   :  { %v328_v61 = vpop.xlane.xlu0 %327  ;;  %v332_v15 = vpop.xlane.xlu2 %331 }
 0x1f3   :  { %v349_v12 = vadd.f32 %v829_v34, %v328_v61  ;;  %v351_v27 = vadd.f32 %v829_v34, %v332_v15 }
 0x1f5   :  { %v417_v25 = vperm.slane %v349_v12, %v416_v11  ;;  %v425_v37 = vperm.slane %v351_v27, %v424_v26 }
 0x1f7   :  { %v419_v32 = vsel %vm418_vm12, %v417_v25, %v415_v24 }
 0x1fa   :  { %v330_v28 = vpop.xlane.xlu1 %329  ;;  %v334_v29 = vpop.xlane.xlu0 %333 }
 0x1fb   :  { %v350_v21 = vadd.f32 %v829_v34, %v330_v28  ;;  %v352_v31 = vadd.f32 %v829_v34, %v334_v29 }
 0x1fd   :  { %v421_v35 = vperm.slane %v350_v21, %v420_v20  ;;  %v429_v36 = vperm.slane %v352_v31, %v428_v22 }
 0x1ff   :  { %v423_v38 = vsel %vm422_vm13, %v421_v35, %v419_v32 }
 0x200   :  { %v427_v39 = vsel %vm426_vm14, %v425_v37, %v423_v38 }
 0x201   :  { %v431_v34 = vsel %vm430_vm15, %v429_v36, %v427_v39 }
 0x202   :  { %433 = vst [vmem:[#allocation3] sm:$0x1] %v431_v34 }
 0x203   :  { %444 = dma.vmem_to_hbm [thread:$0]  %s440_s27, 16, %s442_s30, [#allocation4]  }
 0x204   :  { %594 = dma.done.wait [#allocation4], 16  }
 0x205   :  { %595 = vsyncadd [#allocation4], 4294967280 }
 0x206   :  { %449 = vsyncpa [#allocation4], 1 }

</bundles_post_ra>
